<compile_context>
chip_gen: v5e
topology: v5e:2x2
jax: 0.10.0
libtpu: 0.0.40
codegen_flags: <defaults>
</compile_context>

<pallas_src>
import jax
import jax.numpy as jnp
from jax.experimental import pallas as pl
from jax.experimental.pallas import tpu as pltpu

_MIB = 1024 * 1024
_LANE_WIDTH = 1024            # lane-dense last dim (multiple of 128)
_MAX_TILE_BYTES = 8 * _MIB    # diminishing returns beyond 8 MiB / operand


def _add3_kernel(p1_ref, p2_ref, x_ref, o_ref):
    # Pure VPU elementwise: one tile of (param + param2 + x).
    o_ref[...] = p1_ref[...] + p2_ref[...] + x_ref[...]


def _add2_kernel(a_ref, b_ref, o_ref):
    # Pure VPU elementwise: one tile of (a + b).
    o_ref[...] = a_ref[...] + b_ref[...]


def _vmem_capacity_bytes():
    """Physical VMEM per TensorCore; 64 MiB (v7x) as a conservative fallback."""
    try:
        return int(pltpu.get_tpu_info().vmem_capacity_bytes)
    except Exception:
        return 64 * _MIB


def _vmem_limit_bytes():
    """Scoped-VMEM limit: well above the 16/32 MiB default, with headroom
    below physical capacity (48 MiB on v7x, 96 MiB on v5e/v6e)."""
    cap = _vmem_capacity_bytes()
    limit = min(int(cap * 0.75), cap - 16 * _MIB)
    return max(limit, 32 * _MIB)


def _choose_block_rows(rows, lanes, itemsize, num_buffers, vmem_limit):
    """Largest multiple-of-8 divisor of `rows` whose double-buffered footprint
    (num_buffers operands, 2 buffers each) fits under the scoped VMEM limit,
    capped at _MAX_TILE_BYTES per operand tile."""
    tile_budget = max(_MIB, (vmem_limit - 8 * _MIB) // (2 * num_buffers))
    tile_budget = min(tile_budget, _MAX_TILE_BYTES)
    target = max(8, tile_budget // (lanes * itemsize))
    target = (target // 8) * 8

    if rows <= target:
        return rows                       # full row extent is always legal

    d = min(target, (rows // 8) * 8)      # multiple of 8 by construction
    while d >= 8:
        if rows % d == 0:
            return d
        d -= 8
    # No multiple-of-8 divisor <= target: smallest legal tile, else full extent.
    return 8 if rows % 8 == 0 else rows


def _layout(n, itemsize, num_buffers, vmem_limit):
    """Lane-dense 2-D layout and VMEM-safe row block for a 1-D length n."""
    if n % _LANE_WIDTH == 0:
        lanes = _LANE_WIDTH
    elif n % 128 == 0:
        lanes = 128
    else:
        raise ValueError("N must be a multiple of 128 for this kernel")
    rows = n // lanes
    block_rows = _choose_block_rows(rows, lanes, itemsize, num_buffers, vmem_limit)
    return rows, lanes, block_rows


def _elementwise_add_call(kernel, arrays, flops, bytes_accessed,
                          input_output_aliases=None):
    (n,) = arrays[0].shape
    dtype = arrays[0].dtype
    itemsize = jnp.dtype(dtype).itemsize
    num_buffers = len(arrays) + 1          # inputs + output
    vmem_limit = _vmem_limit_bytes()
    rows, lanes, block_rows = _layout(n, itemsize, num_buffers, vmem_limit)
    arrays_2d = [a.reshape(rows, lanes) for a in arrays]

    spec = pl.BlockSpec((block_rows, lanes), lambda i: (i, 0))

    kwargs = {}
    if input_output_aliases:
        kwargs["input_output_aliases"] = input_output_aliases

    out_2d = pl.pallas_call(
        kernel,
        out_shape=jax.ShapeDtypeStruct((rows, lanes), dtype),
        grid_spec=pl.GridSpec(
            grid=(rows // block_rows,),
            in_specs=[spec] * len(arrays),
            out_specs=spec,
        ),
        compiler_params=pltpu.CompilerParams(
            # "parallel" lets Mosaic shard the streaming grid across both
            # TensorCores on v7x; it is a no-op on single-core v5e/v6e.
            dimension_semantics=("parallel",),
            vmem_limit_bytes=vmem_limit,
        ),
        cost_estimate=pl.CostEstimate(
            flops=flops, transcendentals=0, bytes_accessed=bytes_accessed
        ),
        **kwargs,
    )(*arrays_2d)

    return out_2d.reshape(n)


def large_model_forward(param, param2, x):
    """Single-shot forward: param + param2 + x in one 3-operand Pallas add."""
    assert param.shape == param2.shape == x.shape and param.ndim == 1
    (n,) = param.shape
    return _elementwise_add_call(
        _add3_kernel, [param, param2, x], flops=2 * n, bytes_accessed=16 * n
    )


def make_large_model_forward(param, param2):
    """Amortized forward: fold param + param2 once; each subsequent forward
    reads only 2 vectors instead of 3 (~25% less HBM traffic).
    The fold aliases its output onto operand 0; when this fold is run under
    jit with the parameter buffer donated, no extra param_sum allocation is
    made (matters at N=2**28 on 16 GiB-HBM parts)."""
    assert param.shape == param2.shape and param.ndim == 1
    (n,) = param.shape
    param_sum = _elementwise_add_call(
        _add2_kernel, [param, param2], flops=n, bytes_accessed=12 * n,
        input_output_aliases={0: 0},
    )
    param_sum = jax.block_until_ready(param_sum)
    # TODO(synk): storing param_sum in bf16 would cut another ~17% of forward
    # HBM traffic, but loosens numerics below the f32 test tolerance.

    def forward(x):
        assert x.shape == (n,)
        return _elementwise_add_call(
            _add2_kernel, [param_sum, x], flops=n, bytes_accessed=12 * n
        )

    return forward


if __name__ == "__main__":
    # Scaled-down size (the real module uses 2**28).
    N = 2**15

    key = jax.random.PRNGKey(0)
    k_p1, k_p2, k_x = jax.random.split(key, 3)

    # Deterministic "torch.randn"-style parameter init.
    param = jax.random.normal(k_p1, (N,), dtype=jnp.float32)
    param2 = jax.random.normal(k_p2, (N,), dtype=jnp.float32)
    x = jax.random.normal(k_x, (N,), dtype=jnp.float32)

    ref = param + param2 + x

    # Path 1: direct 3-operand kernel (one call, no amortization).
    out = jax.block_until_ready(large_model_forward(param, param2, x))
    assert out.shape == (N,)
    assert jnp.allclose(out, ref, atol=1e-6, rtol=1e-6)

    # Path 2: amortized path (fold params once, then 2-operand add per call).
    fwd = make_large_model_forward(param, param2)
    out2 = jax.block_until_ready(fwd(x))
    assert jnp.allclose(out2, ref, atol=1e-6, rtol=1e-6)

    print("KERNEL_OK")
</pallas_src>

<mosaic_0001>
module attributes {stable_mosaic.version = 11 : i64} {
  func.func @_add3_kernel(%arg0: i32, %arg1: memref<32x1024xf32, #tpu.memory_space<vmem>>, %arg2: memref<32x1024xf32, #tpu.memory_space<vmem>>, %arg3: memref<32x1024xf32, #tpu.memory_space<vmem>>, %arg4: memref<32x1024xf32, #tpu.memory_space<vmem>>) attributes {dimension_semantics = [#tpu.dimension_semantics<parallel>], iteration_bounds = array<i64: 1>, scalar_prefetch = 0 : i64, scratch_operands = 0 : i64, tpu.core_type = #tpu.core_type<tc>, window_params = [{transform_indices = @transform_0, window_bounds = array<i64: 32, 1024>}, {transform_indices = @transform_1, window_bounds = array<i64: 32, 1024>}, {transform_indices = @transform_2, window_bounds = array<i64: 32, 1024>}, {transform_indices = @transform_3, window_bounds = array<i64: 32, 1024>}]} {
    %c0 = arith.constant 0 : index
    %c0_0 = arith.constant 0 : index
    %0 = vector.load %arg1[%c0, %c0_0] : memref<32x1024xf32, #tpu.memory_space<vmem>>, vector<32x1024xf32>
    %c0_1 = arith.constant 0 : index
    %c0_2 = arith.constant 0 : index
    %1 = vector.load %arg2[%c0_1, %c0_2] : memref<32x1024xf32, #tpu.memory_space<vmem>>, vector<32x1024xf32>
    %2 = arith.addf %0, %1 : vector<32x1024xf32>
    %c0_3 = arith.constant 0 : index
    %c0_4 = arith.constant 0 : index
    %3 = vector.load %arg3[%c0_3, %c0_4] : memref<32x1024xf32, #tpu.memory_space<vmem>>, vector<32x1024xf32>
    %4 = arith.addf %2, %3 : vector<32x1024xf32>
    %c0_5 = arith.constant 0 : index
    %c0_6 = arith.constant 0 : index
    %5 = vector.load %arg4[%c0_5, %c0_6] : memref<32x1024xf32, #tpu.memory_space<vmem>>, vector<32x1024xf32>
    tpu.vector_store %arg4[%c0_5, %c0_6], %4 {strides = array<i32>} : memref<32x1024xf32, #tpu.memory_space<vmem>>, vector<32x1024xf32>,
    return
  }
  func.func @transform_0(%arg0: i32) -> (i32, i32) {
    %c0_i32 = arith.constant 0 : i32
    %c0_i32_0 = arith.constant 0 : i32
    return %arg0, %c0_i32 : i32, i32
  }
  func.func @transform_1(%arg0: i32) -> (i32, i32) {
    %c0_i32 = arith.constant 0 : i32
    %c0_i32_0 = arith.constant 0 : i32
    return %arg0, %c0_i32 : i32, i32
  }
  func.func @transform_2(%arg0: i32) -> (i32, i32) {
    %c0_i32 = arith.constant 0 : i32
    %c0_i32_0 = arith.constant 0 : i32
    return %arg0, %c0_i32 : i32, i32
  }
  func.func @transform_3(%arg0: i32) -> (i32, i32) {
    %c0_i32 = arith.constant 0 : i32
    %c0_i32_0 = arith.constant 0 : i32
    return %arg0, %c0_i32 : i32, i32
  }
}

</mosaic_0001>

<bundles_post_ra>
// kernel: tpu_custom_call.1
= control target key start
LH: loop header
LB: loop body
LE: loop exit
PB: predicated region body
PF: predicated region fallthrough
CT: control target
= control target key end

     0   :  { %8 = vsyncpa [#allocation3], 0  ;;  %s432_s0 = inlined_call_operand.hbm [shape: f32[32,1024], index: 0, kind: input, shape index: {}]   ;;  %s433_s1 = inlined_call_operand.hbm [shape: f32[32,1024], index: 1, kind: input, shape index: {}]   ;;  %s434_s2 = inlined_call_operand.hbm [shape: f32[32,1024], index: 2, kind: input, shape index: {}]   ;;  %s435_s3 = inlined_call_operand.hbm [shape: f32[32,1024], index: 3, kind: output, shape index: {}]  }
   0x1   :  { %9 = vsyncpa [#allocation6], 0 }
   0x2   :  { %10 = vsyncpa [#allocation4], 0  ;;  %s28_s14 = sshll.u32 %s433_s1, 4  ;;  %s382_s15 = smov [#allocation5]   ;;  %s29_s14 = int_to_ptr.hbm [resolvable:$true] %s28_s14 }
   0x3   :  { %s30_s16 = sshll.u32 %s382_s15, 4  ;;  %s15_s19 = sshll.u32 %s432_s0, 4  ;;  %s31_s16 = int_to_ptr.vmem [resolvable:$true] %s30_s16  ;;  %s16_s19 = int_to_ptr.hbm [resolvable:$true] %s15_s19 }
   0x4   :  { %s383_s20 = smov 1024   ;;  %s384_s21 = smov 64  }
   0x5   :  { %36 = dma.hbm_to_vmem [thread:$0]  %s29_s14, 4096, %s31_s16, [#allocation6], %s383_s20, %s383_s20, %s384_s21  }
   0x6   :  { %s385_s22 = smov [#allocation2]   ;;  %s41_s1 = sshll.u32 %s434_s2, 4  ;;  %s42_s1 = int_to_ptr.hbm [resolvable:$true] %s41_s1 }
   0x7   :  { %s17_s23 = sshll.u32 %s385_s22, 4  ;;  %s386_s0 = smov [#allocation7]   ;;  %s18_s23 = int_to_ptr.vmem [resolvable:$true] %s17_s23 }
   0x8   :  { %23 = dma.hbm_to_vmem [thread:$0]  %s16_s19, 4096, %s18_s23, [#allocation3], %s383_s20, %s383_s20, %s384_s21  }
   0x9   :  { %s43_s26 = sshll.u32 %s386_s0, 4  ;;  %s44_s26 = int_to_ptr.vmem [resolvable:$true] %s43_s26 }
   0xa   :  { %49 = dma.hbm_to_vmem [thread:$0]  %s42_s1, 4096, %s44_s26, [#allocation6], %s383_s20, %s383_s20, %s384_s21  }
   0xb   :  { %376 = dma.done.wait [#allocation3], 4096  }
   0xc   :  { %377 = vsyncadd [#allocation3], 4294963200 }
   0xd   :  { %378 = dma.done.wait [#allocation6], 8192  }
   0xe   :  { %379 = vsyncadd [#allocation6], 4294959104  ;;  %v62_v0 = vld [vmem:[#allocation2] sm:$0xff]  ;;  %v63_v4 = vld [vmem:[#allocation2 + $0x8] sm:$0xff]  ;;  %s387_s2 = smov [#allocation8]   ;;  %s260_s30 = sshll.u32 %s435_s3, 4  ;;  %s261_s30 = int_to_ptr.hbm [resolvable:$true] %s260_s30 }
   0xf   :  { %v94_v1 = vld [vmem:[#allocation5] sm:$0xff]  ;;  %v95_v5 = vld [vmem:[#allocation5 + $0x8] sm:$0xff]  ;;  %v64_v8 = vld [vmem:[#allocation2 + $0x10] sm:$0xff]  ;;  %s258_s27 = sshll.u32 %s387_s2, 4  ;;  %s259_s27 = int_to_ptr.vmem [resolvable:$true] %s258_s27 }
  0x10   :  { %v158_v2 = vld [vmem:[#allocation7] sm:$0xff]  ;;  %v126_v3 = vadd.f32 %v94_v1, %v62_v0  ;;  %v159_v6 = vld [vmem:[#allocation7 + $0x8] sm:$0xff]  ;;  %v127_v7 = vadd.f32 %v95_v5, %v63_v4  ;;  %v96_v9 = vld [vmem:[#allocation5 + $0x10] sm:$0xff] }
  0x11   :  { %v160_v10 = vld [vmem:[#allocation7 + $0x10] sm:$0xff]  ;;  %v128_v12 = vadd.f32 %v96_v9, %v64_v8  ;;  %v65_v13 = vld [vmem:[#allocation2 + $0x18] sm:$0xff]  ;;  %v66_v18 = vld [vmem:[#allocation2 + $0x20] sm:$0xff] }
  0x12   :  { %v190_v11 = vadd.f32 %v158_v2, %v126_v3  ;;  %v97_v14 = vld [vmem:[#allocation5 + $0x18] sm:$0xff]  ;;  %v191_v16 = vadd.f32 %v159_v6, %v127_v7  ;;  %v98_v19 = vld [vmem:[#allocation5 + $0x20] sm:$0xff]  ;;  %v67_v23 = vld [vmem:[#allocation2 + $0x28] sm:$0xff] }
  0x13   :  { %v161_v15 = vld [vmem:[#allocation7 + $0x18] sm:$0xff]  ;;  %v129_v17 = vadd.f32 %v97_v14, %v65_v13  ;;  %v162_v20 = vld [vmem:[#allocation7 + $0x20] sm:$0xff]  ;;  %v192_v21 = vadd.f32 %v160_v10, %v128_v12  ;;  %v130_v22 = vadd.f32 %v98_v19, %v66_v18  ;;  %v99_v24 = vld [vmem:[#allocation5 + $0x28] sm:$0xff] }
  0x14   :  { %222 = vst [vmem:[#allocation8] sm:$0xff] %v190_v11  ;;  %v163_v25 = vld [vmem:[#allocation7 + $0x28] sm:$0xff]  ;;  %v131_v27 = vadd.f32 %v99_v24, %v67_v23  ;;  %v68_v28 = vld [vmem:[#allocation2 + $0x30] sm:$0xff]  ;;  %v69_v33 = vld [vmem:[#allocation2 + $0x38] sm:$0xff] }
  0x15   :  { %223 = vst [vmem:[#allocation8 + $0x8] sm:$0xff] %v191_v16  ;;  %v193_v26 = vadd.f32 %v161_v15, %v129_v17  ;;  %v100_v29 = vld [vmem:[#allocation5 + $0x30] sm:$0xff]  ;;  %v194_v31 = vadd.f32 %v162_v20, %v130_v22  ;;  %v101_v34 = vld [vmem:[#allocation5 + $0x38] sm:$0xff]  ;;  %v70_v38 = vld [vmem:[#allocation2 + $0x40] sm:$0xff] }
  0x16   :  { %v164_v30 = vld [vmem:[#allocation7 + $0x30] sm:$0xff]  ;;  %224 = vst [vmem:[#allocation8 + $0x10] sm:$0xff] %v192_v21  ;;  %v132_v32 = vadd.f32 %v100_v29, %v68_v28  ;;  %v165_v35 = vld [vmem:[#allocation7 + $0x38] sm:$0xff]  ;;  %v195_v36 = vadd.f32 %v163_v25, %v131_v27  ;;  %v133_v37 = vadd.f32 %v101_v34, %v69_v33  ;;  %v102_v39 = vld [vmem:[#allocation5 + $0x40] sm:$0xff] }
  0x17   :  { %225 = vst [vmem:[#allocation8 + $0x18] sm:$0xff] %v193_v26  ;;  %v166_v40 = vld [vmem:[#allocation7 + $0x40] sm:$0xff]  ;;  %v134_v42 = vadd.f32 %v102_v39, %v70_v38  ;;  %v71_v43 = vld [vmem:[#allocation2 + $0x48] sm:$0xff]  ;;  %v72_v48 = vld [vmem:[#allocation2 + $0x50] sm:$0xff] }
  0x18   :  { %226 = vst [vmem:[#allocation8 + $0x20] sm:$0xff] %v194_v31  ;;  %v196_v41 = vadd.f32 %v164_v30, %v132_v32  ;;  %v103_v44 = vld [vmem:[#allocation5 + $0x48] sm:$0xff]  ;;  %v197_v46 = vadd.f32 %v165_v35, %v133_v37  ;;  %v104_v49 = vld [vmem:[#allocation5 + $0x50] sm:$0xff]  ;;  %v73_v53 = vld [vmem:[#allocation2 + $0x58] sm:$0xff] }
  0x19   :  { %v167_v45 = vld [vmem:[#allocation7 + $0x48] sm:$0xff]  ;;  %227 = vst [vmem:[#allocation8 + $0x28] sm:$0xff] %v195_v36  ;;  %v135_v47 = vadd.f32 %v103_v44, %v71_v43  ;;  %v168_v50 = vld [vmem:[#allocation7 + $0x50] sm:$0xff]  ;;  %v198_v51 = vadd.f32 %v166_v40, %v134_v42  ;;  %v136_v52 = vadd.f32 %v104_v49, %v72_v48  ;;  %v105_v54 = vld [vmem:[#allocation5 + $0x58] sm:$0xff] }
  0x1a   :  { %228 = vst [vmem:[#allocation8 + $0x30] sm:$0xff] %v196_v41  ;;  %v169_v55 = vld [vmem:[#allocation7 + $0x58] sm:$0xff]  ;;  %v137_v57 = vadd.f32 %v105_v54, %v73_v53  ;;  %v74_v58 = vld [vmem:[#allocation2 + $0x60] sm:$0xff]  ;;  %v75_v63 = vld [vmem:[#allocation2 + $0x68] sm:$0xff] }
  0x1b   :  { %229 = vst [vmem:[#allocation8 + $0x38] sm:$0xff] %v197_v46  ;;  %v199_v56 = vadd.f32 %v167_v45, %v135_v47  ;;  %v106_v59 = vld [vmem:[#allocation5 + $0x60] sm:$0xff]  ;;  %v200_v61 = vadd.f32 %v168_v50, %v136_v52  ;;  %v107_v0 = vld [vmem:[#allocation5 + $0x68] sm:$0xff]  ;;  %v76_v4 = vld [vmem:[#allocation2 + $0x70] sm:$0xff] }
  0x1c   :  { %v170_v60 = vld [vmem:[#allocation7 + $0x60] sm:$0xff]  ;;  %230 = vst [vmem:[#allocation8 + $0x40] sm:$0xff] %v198_v51  ;;  %v138_v62 = vadd.f32 %v106_v59, %v74_v58  ;;  %v171_v1 = vld [vmem:[#allocation7 + $0x68] sm:$0xff]  ;;  %v201_v2 = vadd.f32 %v169_v55, %v137_v57  ;;  %v139_v3 = vadd.f32 %v107_v0, %v75_v63  ;;  %v108_v5 = vld [vmem:[#allocation5 + $0x70] sm:$0xff] }
  0x1d   :  { %231 = vst [vmem:[#allocation8 + $0x48] sm:$0xff] %v199_v56  ;;  %v172_v6 = vld [vmem:[#allocation7 + $0x70] sm:$0xff]  ;;  %v140_v8 = vadd.f32 %v108_v5, %v76_v4  ;;  %v77_v9 = vld [vmem:[#allocation2 + $0x78] sm:$0xff]  ;;  %v78_v14 = vld [vmem:[#allocation2 + $0x80] sm:$0xff] }
  0x1e   :  { %232 = vst [vmem:[#allocation8 + $0x50] sm:$0xff] %v200_v61  ;;  %v202_v7 = vadd.f32 %v170_v60, %v138_v62  ;;  %v109_v10 = vld [vmem:[#allocation5 + $0x78] sm:$0xff]  ;;  %v203_v12 = vadd.f32 %v171_v1, %v139_v3  ;;  %v110_v15 = vld [vmem:[#allocation5 + $0x80] sm:$0xff]  ;;  %v79_v19 = vld [vmem:[#allocation2 + $0x88] sm:$0xff] }
  0x1f   :  { %v173_v11 = vld [vmem:[#allocation7 + $0x78] sm:$0xff]  ;;  %233 = vst [vmem:[#allocation8 + $0x58] sm:$0xff] %v201_v2  ;;  %v141_v13 = vadd.f32 %v109_v10, %v77_v9  ;;  %v174_v16 = vld [vmem:[#allocation7 + $0x80] sm:$0xff]  ;;  %v204_v17 = vadd.f32 %v172_v6, %v140_v8  ;;  %v142_v18 = vadd.f32 %v110_v15, %v78_v14  ;;  %v111_v20 = vld [vmem:[#allocation5 + $0x88] sm:$0xff] }
  0x20   :  { %234 = vst [vmem:[#allocation8 + $0x60] sm:$0xff] %v202_v7  ;;  %v175_v21 = vld [vmem:[#allocation7 + $0x88] sm:$0xff]  ;;  %v143_v23 = vadd.f32 %v111_v20, %v79_v19  ;;  %v80_v24 = vld [vmem:[#allocation2 + $0x90] sm:$0xff]  ;;  %v81_v29 = vld [vmem:[#allocation2 + $0x98] sm:$0xff] }
  0x21   :  { %235 = vst [vmem:[#allocation8 + $0x68] sm:$0xff] %v203_v12  ;;  %v205_v22 = vadd.f32 %v173_v11, %v141_v13  ;;  %v112_v25 = vld [vmem:[#allocation5 + $0x90] sm:$0xff]  ;;  %v206_v27 = vadd.f32 %v174_v16, %v142_v18  ;;  %v113_v30 = vld [vmem:[#allocation5 + $0x98] sm:$0xff]  ;;  %v82_v34 = vld [vmem:[#allocation2 + $0xa0] sm:$0xff] }
  0x22   :  { %v176_v26 = vld [vmem:[#allocation7 + $0x90] sm:$0xff]  ;;  %236 = vst [vmem:[#allocation8 + $0x70] sm:$0xff] %v204_v17  ;;  %v144_v28 = vadd.f32 %v112_v25, %v80_v24  ;;  %v177_v31 = vld [vmem:[#allocation7 + $0x98] sm:$0xff]  ;;  %v207_v32 = vadd.f32 %v175_v21, %v143_v23  ;;  %v145_v33 = vadd.f32 %v113_v30, %v81_v29  ;;  %v114_v35 = vld [vmem:[#allocation5 + $0xa0] sm:$0xff] }
  0x23   :  { %237 = vst [vmem:[#allocation8 + $0x78] sm:$0xff] %v205_v22  ;;  %v178_v36 = vld [vmem:[#allocation7 + $0xa0] sm:$0xff]  ;;  %v146_v38 = vadd.f32 %v114_v35, %v82_v34  ;;  %v83_v39 = vld [vmem:[#allocation2 + $0xa8] sm:$0xff]  ;;  %v84_v44 = vld [vmem:[#allocation2 + $0xb0] sm:$0xff] }
  0x24   :  { %238 = vst [vmem:[#allocation8 + $0x80] sm:$0xff] %v206_v27  ;;  %v208_v37 = vadd.f32 %v176_v26, %v144_v28  ;;  %v115_v40 = vld [vmem:[#allocation5 + $0xa8] sm:$0xff]  ;;  %v209_v42 = vadd.f32 %v177_v31, %v145_v33  ;;  %v116_v45 = vld [vmem:[#allocation5 + $0xb0] sm:$0xff]  ;;  %v85_v49 = vld [vmem:[#allocation2 + $0xb8] sm:$0xff] }
  0x25   :  { %v179_v41 = vld [vmem:[#allocation7 + $0xa8] sm:$0xff]  ;;  %239 = vst [vmem:[#allocation8 + $0x88] sm:$0xff] %v207_v32  ;;  %v147_v43 = vadd.f32 %v115_v40, %v83_v39  ;;  %v180_v46 = vld [vmem:[#allocation7 + $0xb0] sm:$0xff]  ;;  %v210_v47 = vadd.f32 %v178_v36, %v146_v38  ;;  %v148_v48 = vadd.f32 %v116_v45, %v84_v44  ;;  %v117_v50 = vld [vmem:[#allocation5 + $0xb8] sm:$0xff] }
  0x26   :  { %240 = vst [vmem:[#allocation8 + $0x90] sm:$0xff] %v208_v37  ;;  %v181_v51 = vld [vmem:[#allocation7 + $0xb8] sm:$0xff]  ;;  %v149_v53 = vadd.f32 %v117_v50, %v85_v49  ;;  %v86_v54 = vld [vmem:[#allocation2 + $0xc0] sm:$0xff]  ;;  %v87_v59 = vld [vmem:[#allocation2 + $0xc8] sm:$0xff] }
  0x27   :  { %241 = vst [vmem:[#allocation8 + $0x98] sm:$0xff] %v209_v42  ;;  %v211_v52 = vadd.f32 %v179_v41, %v147_v43  ;;  %v118_v55 = vld [vmem:[#allocation5 + $0xc0] sm:$0xff]  ;;  %v212_v57 = vadd.f32 %v180_v46, %v148_v48  ;;  %v119_v60 = vld [vmem:[#allocation5 + $0xc8] sm:$0xff]  ;;  %v88_v0 = vld [vmem:[#allocation2 + $0xd0] sm:$0xff] }
  0x28   :  { %v182_v56 = vld [vmem:[#allocation7 + $0xc0] sm:$0xff]  ;;  %242 = vst [vmem:[#allocation8 + $0xa0] sm:$0xff] %v210_v47  ;;  %v150_v58 = vadd.f32 %v118_v55, %v86_v54  ;;  %v183_v61 = vld [vmem:[#allocation7 + $0xc8] sm:$0xff]  ;;  %v213_v62 = vadd.f32 %v181_v51, %v149_v53  ;;  %v151_v63 = vadd.f32 %v119_v60, %v87_v59  ;;  %v120_v1 = vld [vmem:[#allocation5 + $0xd0] sm:$0xff] }
  0x29   :  { %243 = vst [vmem:[#allocation8 + $0xa8] sm:$0xff] %v211_v52  ;;  %v184_v2 = vld [vmem:[#allocation7 + $0xd0] sm:$0xff]  ;;  %v152_v4 = vadd.f32 %v120_v1, %v88_v0  ;;  %v89_v5 = vld [vmem:[#allocation2 + $0xd8] sm:$0xff]  ;;  %v90_v10 = vld [vmem:[#allocation2 + $0xe0] sm:$0xff] }
  0x2a   :  { %244 = vst [vmem:[#allocation8 + $0xb0] sm:$0xff] %v212_v57  ;;  %v214_v3 = vadd.f32 %v182_v56, %v150_v58  ;;  %v121_v6 = vld [vmem:[#allocation5 + $0xd8] sm:$0xff]  ;;  %v215_v8 = vadd.f32 %v183_v61, %v151_v63  ;;  %v122_v11 = vld [vmem:[#allocation5 + $0xe0] sm:$0xff]  ;;  %v91_v15 = vld [vmem:[#allocation2 + $0xe8] sm:$0xff] }
  0x2b   :  { %v185_v7 = vld [vmem:[#allocation7 + $0xd8] sm:$0xff]  ;;  %245 = vst [vmem:[#allocation8 + $0xb8] sm:$0xff] %v213_v62  ;;  %v153_v9 = vadd.f32 %v121_v6, %v89_v5  ;;  %v186_v12 = vld [vmem:[#allocation7 + $0xe0] sm:$0xff]  ;;  %v216_v13 = vadd.f32 %v184_v2, %v152_v4  ;;  %v154_v14 = vadd.f32 %v122_v11, %v90_v10  ;;  %v123_v16 = vld [vmem:[#allocation5 + $0xe8] sm:$0xff] }
  0x2c   :  { %246 = vst [vmem:[#allocation8 + $0xc0] sm:$0xff] %v214_v3  ;;  %v187_v17 = vld [vmem:[#allocation7 + $0xe8] sm:$0xff]  ;;  %v155_v19 = vadd.f32 %v123_v16, %v91_v15  ;;  %v92_v20 = vld [vmem:[#allocation2 + $0xf0] sm:$0xff]  ;;  %v93_v25 = vld [vmem:[#allocation2 + $0xf8] sm:$0xff] }
  0x2d   :  { %247 = vst [vmem:[#allocation8 + $0xc8] sm:$0xff] %v215_v8  ;;  %v217_v18 = vadd.f32 %v185_v7, %v153_v9  ;;  %v124_v21 = vld [vmem:[#allocation5 + $0xf0] sm:$0xff]  ;;  %v218_v23 = vadd.f32 %v186_v12, %v154_v14  ;;  %v125_v26 = vld [vmem:[#allocation5 + $0xf8] sm:$0xff] }
  0x2e   :  { %v188_v22 = vld [vmem:[#allocation7 + $0xf0] sm:$0xff]  ;;  %248 = vst [vmem:[#allocation8 + $0xd0] sm:$0xff] %v216_v13  ;;  %v156_v24 = vadd.f32 %v124_v21, %v92_v20  ;;  %v189_v27 = vld [vmem:[#allocation7 + $0xf8] sm:$0xff]  ;;  %v219_v28 = vadd.f32 %v187_v17, %v155_v19  ;;  %v157_v29 = vadd.f32 %v125_v26, %v93_v25 }
  0x2f   :  { %249 = vst [vmem:[#allocation8 + $0xd8] sm:$0xff] %v217_v18 }
  0x30   :  { %250 = vst [vmem:[#allocation8 + $0xe0] sm:$0xff] %v218_v23  ;;  %v220_v30 = vadd.f32 %v188_v22, %v156_v24  ;;  %v221_v31 = vadd.f32 %v189_v27, %v157_v29 }
  0x31   :  { %251 = vst [vmem:[#allocation8 + $0xe8] sm:$0xff] %v219_v28 }
  0x32   :  { %252 = vst [vmem:[#allocation8 + $0xf0] sm:$0xff] %v220_v30 }
  0x33   :  { %253 = vst [vmem:[#allocation8 + $0xf8] sm:$0xff] %v221_v31 }
  0x34   :  { %266 = dma.vmem_to_hbm [thread:$0]  %s259_s27, 4096, %s261_s30, [#allocation4], %s383_s20, %s383_s20, %s384_s21  }
  0x35   :  { %380 = dma.done.wait [#allocation4], 4096  }
  0x36   :  { %381 = vsyncadd [#allocation4], 4294963200 }
  0x37   :  { %271 = vsyncpa [#allocation3], 1 }
  0x38   :  { %272 = vsyncpa [#allocation6], 1 }
  0x39   :  { %273 = vsyncpa [#allocation4], 1 }

</bundles_post_ra>
